<compile_context>
chip_gen: v7x
topology: tpu7x:2x2x1
jax: 0.10.0
libtpu: 0.0.40
codegen_flags: <defaults>
</compile_context>

<pallas_src>
import jax
import jax.numpy as jnp
from jax.experimental import pallas as pl
from jax.experimental.pallas import tpu as pltpu

S_SCALE = 30.0      # self.s
NOISE_MUL = 0.5     # self.noise_mul
EPS = 1e-12         # F.normalize eps


def _round_up(n, m):
    return ((n + m - 1) // m) * m


def gcl_norm_linear_kernel(x_ref, wn_ref, margin_ref, o_ref, xn_ref):
    # Recompute the row-normalized (and s-scaled) x only on the first class
    # tile of each batch tile; reuse the VMEM-cached copy for the rest of the
    # class sweep (class axis is "arbitrary", so j iterates sequentially).
    @pl.when(pl.program_id(1) == 0)
    def _():
        x = x_ref[...].astype(jnp.float32)                       # (TM, D)
        sumsq = jnp.sum(x * x, axis=1, keepdims=True)
        inv_x = jax.lax.rsqrt(jnp.maximum(sumsq, EPS * EPS)) * S_SCALE
        xn_ref[...] = (x * inv_x).astype(jnp.bfloat16)           # (TM, D) bf16

    # s * cosine on the MXU, f32 accumulate.  Weight tile is already
    # column-normalized bf16 (hoisted to the wrapper).
    s_cos = jnp.dot(xn_ref[...], wn_ref[...],
                    preferred_element_type=jnp.float32)          # (TM, TN)

    # Margin already pre-folded in the wrapper: margin = coef * |noise|.
    out = s_cos - margin_ref[...].astype(jnp.float32)
    o_ref[...] = out.astype(o_ref.dtype)


def gcl_norm_linear(x, weight, noise, m_list, *, tm=256, tn=512):
    """Forward of GCl_NormLinear (target=None path).

    x:      (B, D) features
    weight: (D, C) classifier weight
    noise:  (B, C) pre-sampled Normal(0, 1/3) noise, clamped to [-1, 1]
    m_list: (C,)   class margins (log(n).max() - log(n))
    """
    B, D = x.shape
    C = weight.shape[1]

    # ---- tile sizing & padding (lane-dense: multiples of 128 on C and D) ----
    tm = max(8, min(tm, _round_up(B, 8)))
    tn = max(128, min(tn, _round_up(C, 128)))
    d_pad = _round_up(D, 128)
    b_pad = _round_up(B, tm)
    c_pad = _round_up(C, tn)

    # ---- one-time prep in plain XLA (reused across every batch tile) ----
    # Column-normalized weight, bf16, padded: one fused XLA pass.
    # (Hoist this out of the per-call path entirely if the weight is reused
    #  across many forward calls, e.g. inference.)
    w32 = weight.astype(jnp.float32)
    w_sumsq = jnp.sum(w32 * w32, axis=0, keepdims=True)
    wn = (w32 * jax.lax.rsqrt(jnp.maximum(w_sumsq, EPS * EPS))).astype(jnp.bfloat16)
    wnp = jnp.pad(wn, ((0, d_pad - D), (0, c_pad - C)))

    # Margin coefficient: coef = s * noise_mul / m_max * m_list (all-zero when
    # m_list.max() == 0, reproducing the PyTorch branch).  Pre-fold coef*|noise|
    # into one bf16 (B, C) array — abs + mul + cast + pad fuse into one pass.
    m32 = m_list.astype(jnp.float32)
    mmax = jnp.max(m32)
    safe_mmax = jnp.where(mmax == 0.0, 1.0, mmax)
    coef = m32 * jnp.where(mmax == 0.0, 0.0, S_SCALE * NOISE_MUL) / safe_mmax
    margin = (coef[None, :] * jnp.abs(noise.astype(jnp.float32))).astype(jnp.bfloat16)
    marginp = jnp.pad(margin, ((0, b_pad - B), (0, c_pad - C)))

    xp = jnp.pad(x, ((0, b_pad - B), (0, d_pad - D)))

    grid = (b_pad // tm, c_pad // tn)

    # ---- VMEM budget: double-buffered inputs/outputs + the xn scratch ----
    out_itemsize = jnp.dtype(x.dtype).itemsize
    working_set = (
        2 * (tm * d_pad * 4          # x tile (f32), double-buffered
             + d_pad * tn * 2        # weight tile (bf16)
             + tm * tn * 2           # margin tile (bf16)
             + tm * tn * out_itemsize)  # output tile
        + tm * d_pad * 2             # xn scratch (bf16, single buffer)
    )
    vmem_limit = int(min(max(working_set + (4 << 20), 16 << 20), 48 << 20))

    cost = pl.CostEstimate(
        flops=2 * b_pad * d_pad * c_pad,
        transcendentals=b_pad,                      # one rsqrt per row
        bytes_accessed=(b_pad * d_pad * 4                      # x read
                        + (b_pad // tm) * d_pad * c_pad * 2    # weight stream
                        + b_pad * c_pad * 2                    # margin read
                        + b_pad * c_pad * out_itemsize),       # output write
    )

    # TODO(synk): target-conditioned branch (one-hot scatter + `cosine - m`) is
    # a no-op for m == 0 (as set in __init__); only the target=None path is lowered.
    out = pl.pallas_call(
        gcl_norm_linear_kernel,
        out_shape=jax.ShapeDtypeStruct((b_pad, c_pad), x.dtype),
        grid=grid,
        in_specs=[
            pl.BlockSpec((tm, d_pad), lambda i, j: (i, 0)),   # x (constant over j)
            pl.BlockSpec((d_pad, tn), lambda i, j: (0, j)),   # normalized weight
            pl.BlockSpec((tm, tn), lambda i, j: (i, j)),      # pre-folded margin
        ],
        out_specs=pl.BlockSpec((tm, tn), lambda i, j: (i, j)),
        scratch_shapes=[pltpu.VMEM((tm, d_pad), jnp.bfloat16)],  # cached xn
        compiler_params=pltpu.CompilerParams(
            dimension_semantics=("parallel", "arbitrary"),
            vmem_limit_bytes=vmem_limit),
        cost_estimate=cost,
    )(xp, wnp, marginp)

    return out[:B, :C]


def _reference(x, weight, noise, m_list):
    """Pure-JAX f32 reference of the PyTorch forward (target=None)."""
    xn = x / jnp.maximum(jnp.linalg.norm(x, axis=1, keepdims=True), EPS)
    wn = weight / jnp.maximum(jnp.linalg.norm(weight, axis=0, keepdims=True), EPS)
    cosine = xn @ wn
    mmax = jnp.max(m_list)
    adj = cosine - NOISE_MUL * jnp.abs(noise) / jnp.where(mmax == 0.0, 1.0, mmax) * m_list
    cosine = jnp.where(mmax == 0.0, cosine, adj)
    return S_SCALE * cosine


if __name__ == "__main__":
    key = jax.random.PRNGKey(0)
    kx, kw, kn = jax.random.split(key, 3)

    B, D, C = 8, 32, 16   # batch, in_features, out_features (num classes)

    # input features
    x = jax.random.normal(kx, (B, D), dtype=jnp.float32)

    # weight init: uniform_(-1, 1).renorm_(2, 1, 1e-5).mul_(1e5) -> unit-norm cols
    w = jax.random.uniform(kw, (D, C), dtype=jnp.float32, minval=-1.0, maxval=1.0)
    col_norm = jnp.sqrt(jnp.sum(w * w, axis=0, keepdims=True))
    scale = jnp.where(col_norm > 1e-5, 1e-5 / (col_norm + 1e-7), 1.0)
    w = w * scale * 1e5

    # cls_num_list -> m_list = log(n).max() - log(n)
    cls_num_list = jnp.array(
        [500, 300, 200, 150, 120, 100, 80, 60, 50, 40, 30, 20, 15, 10, 8, 5],
        dtype=jnp.float32,
    )
    m_list = jnp.log(cls_num_list)
    m_list = jnp.max(m_list) - m_list

    # noise = Normal(0, 1/3).sample(cosine.shape).clamp(-1, 1), sampled up front
    noise = jnp.clip(jax.random.normal(kn, (B, C), dtype=jnp.float32) * (1.0 / 3.0),
                     -1.0, 1.0)

    out = gcl_norm_linear(x, w, noise, m_list)
    jax.block_until_ready(out)

    assert out.shape == (B, C) and out.dtype == jnp.float32
    ref = _reference(x, w, noise, m_list)
    max_err = float(jnp.max(jnp.abs(out - ref)))
    # Error budget: bf16 rounding of xn/wn bounds the cosine error by ~4e-3
    # (f32 accumulate, unit-norm rows/cols) -> 0.12 on s=30 logits; bf16
    # rounding of the pre-folded margin (|coef| <= 15) adds <= ~0.06.
    assert max_err < 0.25, f"max abs error {max_err} too large"
    print("KERNEL_OK")
</pallas_src>

<mosaic_0001>
module attributes {stable_mosaic.version = 11 : i64} {
  func.func @gcl_norm_linear_kernel(%arg0: i32, %arg1: i32, %arg2: memref<8x128xf32, #tpu.memory_space<vmem>>, %arg3: memref<128x128xbf16, #tpu.memory_space<vmem>>, %arg4: memref<8x128xbf16, #tpu.memory_space<vmem>>, %arg5: memref<8x128xf32, #tpu.memory_space<vmem>>, %arg6: memref<8x128xbf16, #tpu.memory_space<vmem>>) attributes {dimension_semantics = [#tpu.dimension_semantics<parallel>, #tpu.dimension_semantics<arbitrary>], iteration_bounds = array<i64: 1, 1>, scalar_prefetch = 0 : i64, scratch_operands = 1 : i64, tpu.core_type = #tpu.core_type<tc>, window_params = [{transform_indices = @transform_0, window_bounds = array<i64: 8, 128>}, {transform_indices = @transform_1, window_bounds = array<i64: 128, 128>}, {transform_indices = @transform_2, window_bounds = array<i64: 8, 128>}, {transform_indices = @transform_3, window_bounds = array<i64: 8, 128>}]} {
    %c0_i32 = arith.constant 0 : i32
    %0 = arith.cmpi eq, %arg1, %c0_i32 : i32
    %1 = arith.extui %0 : i1 to i32
    %c0_i32_0 = arith.constant 0 : i32
    %2 = arith.cmpi ne, %1, %c0_i32_0 : i32
    scf.if %2 {
      %c0_8 = arith.constant 0 : index
      %c0_9 = arith.constant 0 : index
      %10 = vector.load %arg2[%c0_8, %c0_9] : memref<8x128xf32, #tpu.memory_space<vmem>>, vector<8x128xf32>
      %11 = arith.mulf %10, %10 : vector<8x128xf32>
      %cst_10 = arith.constant dense<0.000000e+00> : vector<8xf32>
      %12 = vector.multi_reduction <add>, %11, %cst_10 [1] : vector<8x128xf32> to vector<8xf32>
      %13 = vector.shape_cast %12 : vector<8xf32> to vector<8x1xf32>
      %cst_11 = arith.constant 1.000000e-24 : f32
      %14 = vector.broadcast %cst_11 : f32 to vector<8x1xf32>
      %15 = arith.maximumf %13, %14 : vector<8x1xf32>
      %16 = math.rsqrt %15 : vector<8x1xf32>
      %cst_12 = arith.constant 3.000000e+01 : f32
      %17 = vector.broadcast %cst_12 : f32 to vector<8x1xf32>
      %18 = arith.mulf %16, %17 : vector<8x1xf32>
      %19 = vector.broadcast %18 : vector<8x1xf32> to vector<8x128xf32>
      %20 = arith.mulf %10, %19 : vector<8x128xf32>
      %21 = arith.truncf %20 : vector<8x128xf32> to vector<8x128xbf16>
      %c0_13 = arith.constant 0 : index
      %c0_14 = arith.constant 0 : index
      %22 = vector.load %arg6[%c0_13, %c0_14] : memref<8x128xbf16, #tpu.memory_space<vmem>>, vector<8x128xbf16>
      tpu.vector_store %arg6[%c0_13, %c0_14], %21 {strides = array<i32>} : memref<8x128xbf16, #tpu.memory_space<vmem>>, vector<8x128xbf16>,
    } else {
    }
    %c0 = arith.constant 0 : index
    %c0_1 = arith.constant 0 : index
    %3 = vector.load %arg6[%c0, %c0_1] : memref<8x128xbf16, #tpu.memory_space<vmem>>, vector<8x128xbf16>
    %c0_2 = arith.constant 0 : index
    %c0_3 = arith.constant 0 : index
    %4 = vector.load %arg3[%c0_2, %c0_3] : memref<128x128xbf16, #tpu.memory_space<vmem>>, vector<128x128xbf16>
    %cst = arith.constant dense<0.000000e+00> : vector<8x128xf32>
    %5 = tpu.matmul %3, %4, %cst {dimension_numbers = #tpu.dot_dimension_numbers<[1], [0], [0], [1], [0, 0, 1, 1], [], []>} : vector<8x128xbf16>, vector<128x128xbf16>, vector<8x128xf32> -> vector<8x128xf32>
    %c0_4 = arith.constant 0 : index
    %c0_5 = arith.constant 0 : index
    %6 = vector.load %arg4[%c0_4, %c0_5] : memref<8x128xbf16, #tpu.memory_space<vmem>>, vector<8x128xbf16>
    %7 = arith.extf %6 : vector<8x128xbf16> to vector<8x128xf32>
    %8 = arith.subf %5, %7 : vector<8x128xf32>
    %c0_6 = arith.constant 0 : index
    %c0_7 = arith.constant 0 : index
    %9 = vector.load %arg5[%c0_6, %c0_7] : memref<8x128xf32, #tpu.memory_space<vmem>>, vector<8x128xf32>
    tpu.vector_store %arg5[%c0_6, %c0_7], %8 {strides = array<i32>} : memref<8x128xf32, #tpu.memory_space<vmem>>, vector<8x128xf32>,
    return
  }
  func.func @transform_0(%arg0: i32, %arg1: i32) -> (i32, i32) {
    %c0_i32 = arith.constant 0 : i32
    %c0_i32_0 = arith.constant 0 : i32
    return %arg0, %c0_i32 : i32, i32
  }
  func.func @transform_1(%arg0: i32, %arg1: i32) -> (i32, i32) {
    %c0_i32 = arith.constant 0 : i32
    %c0_i32_0 = arith.constant 0 : i32
    return %c0_i32, %arg1 : i32, i32
  }
  func.func @transform_2(%arg0: i32, %arg1: i32) -> (i32, i32) {
    %c0_i32 = arith.constant 0 : i32
    return %arg0, %arg1 : i32, i32
  }
  func.func @transform_3(%arg0: i32, %arg1: i32) -> (i32, i32) {
    %c0_i32 = arith.constant 0 : i32
    return %arg0, %arg1 : i32, i32
  }
}

</mosaic_0001>

<bundles_post_ra>
// kernel: tpu_custom_call.1
= control target key start
LH: loop header
LB: loop body
LE: loop exit
PB: predicated region body
PF: predicated region fallthrough
CT: control target
= control target key end

     0   :  { %8 = vsyncpa [#allocation4], 0  ;;  %s380_s0 = inlined_call_operand.hbm [shape: f32[8,128], index: 0, kind: input, shape index: {}]   ;;  %s381_s1 = inlined_call_operand.hbm [shape: bf16[128,128], index: 1, kind: input, shape index: {}]   ;;  %s382_s2 = inlined_call_operand.vmem [shape: bf16[8,128], index: 2, kind: input, shape index: {}]   ;;  %s383_s3 = inlined_call_operand.hbm [shape: f32[8,128], index: 3, kind: output, shape index: {}]  }
   0x1   :  { %9 = vsyncpa [#allocation7], 0 }
   0x2   :  { %10 = vsyncpa [#allocation5], 0  ;;  %s307_s12 = smov [#allocation3]   ;;  %s308_s14 = smov [#allocation6]  }
   0x3   :  { %s17_s13 = sshll.u32 %s307_s12, 4  ;;  %s26_s15 = sshll.u32 %s308_s14, 4  ;;  %s18_s13 = int_to_ptr.vmem [resolvable:$true] %s17_s13  ;;  %s334_s15 = int_to_ptr.vmem [resolvable:$true] %s26_s15 }
   0x4   :  { %s235_s18 = scalar_lea.hbm %s380_s0, 128 }
   0x5   :  { %p236_p0 = scmp.ne.s32.totalorder %s380_s0, %s235_s18  ;;  %p239_p1 = scmp.lt.u32.totalorder %s235_s18, %s380_s0 }
   0x7   :  { %p241_p2 = pnand %p239_p1, %p236_p0 }
   0x9   :  { %244 = shalt.err (!%p241_p2)
}
   0xa   :  { %s245_s23 = scalar_lea.vmem %s18_s13, 128  ;;  %p250_p4 = scmp.lt.s32.totalorder %s18_s13, %s18_s13 }
   0xb   :  { %p246_p3 = scmp.ne.s32.totalorder %s18_s13, %s245_s23  ;;  %p251_p5 = scmp.lt.s32.totalorder %s245_s23, %s245_s23 }
   0xd   :  { %p252_p6 = por %p251_p5, %p250_p4 }
   0xf   :  { %p253_p7 = pnand %p252_p6, %p246_p3 }
  0x11   :  { %256 = shalt.err (!%p253_p7)
}
  0x12   :  { %20 = dma.hbm_to_vmem [thread:$0]  %s380_s0, 128, %s18_s13, [#allocation4]  }
  0x13   :  { %s257_s28 = scalar_lea.hbm %s381_s1, 1024 }
  0x14   :  { %p258_p8 = scmp.ne.s32.totalorder %s381_s1, %s257_s28  ;;  %p261_p9 = scmp.lt.u32.totalorder %s257_s28, %s381_s1 }
  0x16   :  { %p263_p10 = pnand %p261_p9, %p258_p8 }
  0x18   :  { %266 = shalt.err (!%p263_p10)
}
  0x19   :  { %s267_s6 = scalar_lea.vmem %s334_s15, 1024  ;;  %p272_p12 = scmp.lt.s32.totalorder %s334_s15, %s334_s15 }
  0x1a   :  { %p268_p11 = scmp.ne.s32.totalorder %s334_s15, %s267_s6  ;;  %p273_p13 = scmp.lt.s32.totalorder %s267_s6, %s267_s6 }
  0x1c   :  { %p274_p0 = por %p273_p13, %p272_p12 }
  0x1e   :  { %p275_p1 = pnand %p274_p0, %p268_p11 }
  0x20   :  { %278 = shalt.err (!%p275_p1)
}
  0x21   :  { %s309_s0 = smov 64   ;;  %s310_s7 = smov 4  }
  0x22   :  { %32 = dma.hbm_to_vmem [thread:$0]  %s381_s1, 1024, %s334_s15, [#allocation7], %s309_s0, %s309_s0, %s310_s7  }
  0x23   :  { %301 = dma.done.wait [#allocation4], 128  }
  0x24   :  { %302 = vsyncadd [#allocation4], 4294967168 }
  0x25   :  { %303 = dma.done.wait [#allocation7], 1024  }
  0x26   :  { %304 = vsyncadd [#allocation7], 4294966272  ;;  %v311_v0 = vmov 0.0   ;;  %v46_v1 = vld [vmem:[#allocation3] sm:$0xff]  ;;  %v225_v3 = vld [vmem:[#allocation6] sm:$0xff]   ;;  %vm312_vm0 = vmmov 0  }
  0x27   :  { %198 = vmatprep.subr.bf16.mxu0 %v311_v0  ;;  %v47_v2 = vmul.f32 %v46_v1, %v46_v1  ;;  %v226_v4 = vld [vmem:[#allocation6 + $0x8] sm:$0xff]   ;;  %v227_v5 = vld [vmem:[#allocation6 + $0x10] sm:$0xff]   ;;  %v228_v6 = vld [vmem:[#allocation6 + $0x18] sm:$0xff]   ;;  %214 = vmatprep.mubr.msk.bf16.mxu0 %vm312_vm0, %v311_v0  ;;  %s313_s11 = smov [#allocation8]  }
  0x28   :  { %199 = vmatpush3.bf16.msra.mxu0 %v225_v3  ;;  %v229_v7 = vld [vmem:[#allocation6 + $0x20] sm:$0xff]   ;;  %v230_v8 = vld [vmem:[#allocation6 + $0x28] sm:$0xff]   ;;  %v231_v9 = vld [vmem:[#allocation6 + $0x30] sm:$0xff]   ;;  %s171_s12 = sshll.u32 %s313_s11, 4  ;;  %s172_s12 = int_to_ptr.vmem [resolvable:$true] %s171_s12 }
  0x29   :  { %48 = vadd.xlane.f32.xlu0 %v47_v2  ;;  %200 = vmatprep.subr.bf16.mxu0 %v311_v0  ;;  %v232_v10 = vld [vmem:[#allocation6 + $0x38] sm:$0xff]   ;;  %v161_v18 = vld [vmem:[%s382_s2] sm:$0xf]  ;;  %s279_s13 = scalar_lea.vmem %s172_s12, 128  ;;  %p284_p3 = scmp.lt.s32.totalorder %s172_s12, %s172_s12 }
  0x2a   :  { %v162_v19 = vunpack.c.l.bf16 %v161_v18  ;;  %p280_p2 = scmp.ne.s32.totalorder %s172_s12, %s279_s13  ;;  %p285_p4 = scmp.lt.s32.totalorder %s279_s13, %s279_s13 }
  0x2c   :  { %201 = vmatpush3.bf16.msra.mxu0 %v226_v4  ;;  %p286_p5 = por %p285_p4, %p284_p3 }
  0x2d   :  { %202 = vmatprep.subr.bf16.mxu0 %v311_v0 }
  0x2e   :  { %p287_p6 = pnand %p286_p5, %p280_p2 }
  0x30   :  { %203 = vmatpush3.bf16.msra.mxu0 %v227_v5 }
  0x31   :  { %204 = vmatprep.subr.bf16.mxu0 %v311_v0 }
  0x34   :  { %205 = vmatpush3.bf16.msra.mxu0 %v228_v6 }
  0x35   :  { %206 = vmatprep.subr.bf16.mxu0 %v311_v0 }
  0x38   :  { %207 = vmatpush3.bf16.msra.mxu0 %v229_v7 }
  0x39   :  { %208 = vmatprep.subr.bf16.mxu0 %v311_v0 }
  0x3c   :  { %209 = vmatpush3.bf16.msra.mxu0 %v230_v8 }
  0x3d   :  { %210 = vmatprep.subr.bf16.mxu0 %v311_v0 }
  0x40   :  { %211 = vmatpush3.bf16.msra.mxu0 %v231_v9 }
  0x41   :  { %212 = vmatprep.subr.bf16.mxu0 %v311_v0 }
  0x44   :  { %213 = vmatpush3.bf16.msra.mxu0 %v232_v10 }
  0xb6   :  { %v49_v11 = vpop.xlane.xlu0 %48 }
  0xb7   :  { %v50_v12 = vmax.f32 %v49_v11, 1e-24 }
  0xb9   :  { %233 = vrsqrt.f32 %v50_v12 }
  0xc3   :  { %v234_v13 = vpop.eup %233 }
  0xc4   :  { %v52_v14 = vmul.f32 30.0, %v234_v13 }
  0xc6   :  { %v53_v15 = vmul.f32 %v52_v14, %v46_v1 }
  0xc8   :  { %v54_v16 = vpack.c.bf16 %v53_v15, %v53_v15 }
  0xca   :  { %55 = vst [vmem:[#allocation2] sm:$0xf] %v54_v16 }
  0xd1   :  { %v56_v17 = vld [vmem:[#allocation2] sm:$0xf] }
  0xd2   :  { %215 = vmatmul.mubr.bf16.vlgmr.msra.gmra.mrb[0].mxu0 %v56_v17 }
 0x1a5   :  { %v155_v20 = vpop.f32.mrb[0].mxu0 }
 0x1a6   :  { %v163_v21 = vsub.f32 %v155_v20, %v162_v19  ;;  %v216_v22 = vpop.f32.mrb[1].mxu0 }
 0x1a7   :  { %v158_v23 = vpop.f32.mrb[2].mxu0 }
 0x1a8   :  { %164 = vst [vmem:[#allocation8] sm:$0xff] %v163_v21  ;;  %v217_v24 = vpop.f32.mrb[3].mxu0 }
 0x1a9   :  { %290 = shalt.err (!%p287_p6)
}
 0x1aa   :  { %s291_s2 = scalar_lea.hbm %s383_s3, 128 }
 0x1ab   :  { %p292_p7 = scmp.ne.s32.totalorder %s383_s3, %s291_s2  ;;  %p295_p8 = scmp.lt.u32.totalorder %s291_s2, %s383_s3 }
 0x1ad   :  { %p297_p9 = pnand %p295_p8, %p292_p7 }
 0x1af   :  { %300 = shalt.err (!%p297_p9)
}
 0x1b0   :  { %174 = dma.vmem_to_hbm [thread:$0]  %s172_s12, 128, %s383_s3, [#allocation5]  }
 0x1b1   :  { %305 = dma.done.wait [#allocation5], 128  }
 0x1b2   :  { %306 = vsyncadd [#allocation5], 4294967168 }
 0x1b3   :  { %178 = vsyncpa [#allocation4], 1 }
 0x1b4   :  { %179 = vsyncpa [#allocation7], 1 }
 0x1b5   :  { %180 = vsyncpa [#allocation5], 1 }

</bundles_post_ra>
